<compile_context>
chip_gen: v6e
topology: v6e:2x2x1
jax: 0.10.0
libtpu: 0.0.40
codegen_flags: <defaults>
</compile_context>

<pallas_src>
import functools
import math

import jax
import jax.numpy as jnp
from jax.experimental import pallas as pl
from jax.experimental.pallas import tpu as pltpu

# ---------------- configuration (small, consistent with the module) ----------
BATCH = 2
SEQ = 8
HIDDEN = 32
HEADS = 4
DK = HIDDEN // HEADS
EPS = 1e-6        # Python float: never a captured jnp constant
NEG_INF = -1e30   # Python float: only used host-side when packing the mask


# -------------------- packed parameter buffer layout --------------------------
def _param_rows(hidden, n):
    """Row offsets inside the packed (rows, 3*hidden) f32 parameter buffer.
    All multi-row slabs start on 8-row (sublane-group) boundaries."""
    r_bqkv = hidden              # 1 row:  [b_q | b_k | b_v]            (cols 0:3H)
    r_wo = r_bqkv + 8            # hidden rows: W_o                     (cols 0:H)
    r_vec = r_wo + hidden        # rows: gamma / beta / b_o             (cols 0:H)
    r_mask = r_vec + 8           # n rows: additive block-diagonal mask (cols 0:n)
    total = r_mask + max(n, 8)
    return r_bqkv, r_wo, r_vec, r_mask, total


def pack_atten_params(params, batch=BATCH, seq=SEQ):
    """One-time (init-time) packing of every parameter the kernel needs into a
    single 2-D f32 buffer.  Done once per model, NOT per forward call."""
    H = params["gamma"].shape[0]
    n = batch * seq
    r_bqkv, r_wo, r_vec, r_mask, total = _param_rows(H, n)

    # Fused QKV weight so the projection is one (n,H)@(H,3H) matmul.
    w_qkv = jnp.concatenate([params["wq"], params["wk"], params["wv"]], axis=1)  # (H, 3H)
    b_qkv = jnp.concatenate([params["bq"], params["bk"], params["bv"]])          # (3H,)

    # Additive block-diagonal mask: 0 inside a batch element, -1e30 across.
    row_blk = jnp.arange(n, dtype=jnp.int32) // seq
    add_mask = jnp.where(row_blk[:, None] == row_blk[None, :], 0.0, NEG_INF)     # (n, n)

    buf = jnp.zeros((total, 3 * H), jnp.float32)
    buf = buf.at[0:H, :].set(w_qkv)
    buf = buf.at[r_bqkv, :].set(b_qkv)
    buf = buf.at[r_wo:r_wo + H, 0:H].set(params["wo"])
    buf = buf.at[r_vec, 0:H].set(params["gamma"])
    buf = buf.at[r_vec + 1, 0:H].set(params["beta"])
    buf = buf.at[r_vec + 2, 0:H].set(params["bo"])
    buf = buf.at[r_mask:r_mask + n, 0:n].set(add_mask)
    return buf


# ------------------------------- kernel --------------------------------------
def atten_block_kernel(x_ref, p_ref, o_ref, *, batch, seq, hidden, heads, dk):
    n = batch * seq
    r_bqkv, r_wo, r_vec, r_mask, _ = _param_rows(hidden, n)

    x = x_ref[...].astype(jnp.float32)                                  # (n, H)

    gamma = p_ref[r_vec:r_vec + 1, 0:hidden]                            # (1, H)
    beta = p_ref[r_vec + 1:r_vec + 2, 0:hidden]                         # (1, H)
    b_o = p_ref[r_vec + 2:r_vec + 3, 0:hidden]                          # (1, H)

    # ---- LayerNorm: gamma*(x-mean)/(std_unbiased + eps) + beta (exact math) ----
    mean = jnp.mean(x, axis=-1, keepdims=True)                          # (n, 1)
    diff = x - mean
    var_u = jnp.sum(diff * diff, axis=-1, keepdims=True) / (hidden - 1)
    inv_std = 1.0 / (jnp.sqrt(var_u) + EPS)                             # 16 values: exactness is free
    ln = diff * (gamma * inv_std) + beta                                # (n, H)

    # ---- fused QKV projection: ONE (n,H)@(H,3H) MXU matmul ----
    w_qkv = p_ref[0:hidden, :]                                          # (H, 3H)
    b_qkv = p_ref[r_bqkv:r_bqkv + 1, :]                                 # (1, 3H)
    qkv = jnp.dot(ln, w_qkv, preferred_element_type=jnp.float32) + b_qkv  # (n, 3H)

    # ---- per-head scaled dot-product attention (static 4-way loop, all 2-D) ----
    mask_bias = p_ref[r_mask:r_mask + n, 0:n]                           # (n, n): 0 / -1e30
    scale = 1.0 / math.sqrt(dk)
    ctx_heads = []
    for h in range(heads):
        qh = qkv[:, h * dk:(h + 1) * dk]                                # (n, dk)
        kh = qkv[:, hidden + h * dk: hidden + (h + 1) * dk]             # (n, dk)
        vh = qkv[:, 2 * hidden + h * dk: 2 * hidden + (h + 1) * dk]     # (n, dk)
        # scores = qh @ kh^T  (contract last dims, flash-attention style)
        s = jax.lax.dot_general(qh, kh, (((1,), (1,)), ((), ())),
                                preferred_element_type=jnp.float32) * scale
        s = s + mask_bias                                               # forbid cross-batch attention
        m = jnp.max(s, axis=-1, keepdims=True)
        e = jnp.exp(s - m)
        p = e / jnp.sum(e, axis=-1, keepdims=True)
        ctx_heads.append(jnp.dot(p, vh, preferred_element_type=jnp.float32))  # (n, dk)

    ctx = jnp.concatenate(ctx_heads, axis=1)                            # (n, H), head order

    # ---- output projection: ONE (n,H)@(H,H) matmul ----
    w_o = p_ref[r_wo:r_wo + hidden, 0:hidden]                           # (H, H)
    attn = jnp.dot(ctx, w_o, preferred_element_type=jnp.float32) + b_o  # (n, H)

    # dropout (p=0.1) layers are identity in eval mode; residual add.
    # TODO(synk): train-mode dropout (RNG masks) is not implemented.
    o_ref[...] = (x + attn).astype(o_ref.dtype)


# ------------------------------- wrapper --------------------------------------
def atten_block(x, packed_params, heads=HEADS):
    """x: (B, S, H) float32.  packed_params: result of pack_atten_params()."""
    B, S, H = x.shape
    n = B * S
    dk = H // heads
    x2d = x.reshape(n, H)

    kern = functools.partial(atten_block_kernel, batch=B, seq=S, hidden=H,
                             heads=heads, dk=dk)
    vmem = pl.BlockSpec(memory_space=pltpu.MemorySpace.VMEM)

    cost = pl.CostEstimate(
        flops=2 * n * H * (3 * H) + heads * (2 * n * n * dk) * 2 + 2 * n * H * H,
        transcendentals=heads * n * n + n,                 # exp + sqrt
        bytes_accessed=(2 * x2d.size + packed_params.size) * 4,
    )

    out2d = pl.pallas_call(
        kern,
        out_shape=jax.ShapeDtypeStruct((n, H), x.dtype),
        in_specs=[vmem, vmem],
        out_specs=vmem,
        # x is fully loaded before the single writeback; donate x under jit to
        # actually reuse the buffer (harmless copy is inserted otherwise).
        input_output_aliases={0: 0},
        cost_estimate=cost,
    )(x2d, packed_params)
    return out2d.reshape(B, S, H)


# ------------------------ pure-JAX reference (for checking) -------------------
def atten_block_ref(x, params):
    mean = jnp.mean(x, axis=-1, keepdims=True)
    diff = x - mean
    var_u = jnp.sum(diff * diff, axis=-1, keepdims=True) / (HIDDEN - 1)
    ln = params["gamma"] * diff / (jnp.sqrt(var_u) + EPS) + params["beta"]

    q = ln @ params["wq"] + params["bq"]
    k = ln @ params["wk"] + params["bk"]
    v = ln @ params["wv"] + params["bv"]
    B, S, H = x.shape
    qh = q.reshape(B, S, HEADS, DK).transpose(0, 2, 1, 3)
    kh = k.reshape(B, S, HEADS, DK).transpose(0, 2, 1, 3)
    vh = v.reshape(B, S, HEADS, DK).transpose(0, 2, 1, 3)
    scores = jnp.einsum("bhqd,bhkd->bhqk", qh, kh) / math.sqrt(DK)
    p = jax.nn.softmax(scores, axis=-1)
    ctx = jnp.einsum("bhqk,bhkd->bhqd", p, vh).transpose(0, 2, 1, 3).reshape(B, S, H)
    return x + (ctx @ params["wo"] + params["bo"])


# ------------------------------- params ----------------------------------------
def make_params(key, hidden):
    ks = jax.random.split(key, 8)
    bound = 1.0 / math.sqrt(hidden)

    def lin_w(k):
        # PyTorch nn.Linear stores weight as (out, in); sample (out, in) and
        # transpose so y = x @ W (== x @ weight^T).
        w = jax.random.uniform(k, (hidden, hidden), jnp.float32, -bound, bound)
        return w.T

    def lin_b(k):
        return jax.random.uniform(k, (hidden,), jnp.float32, -bound, bound)

    return {
        "wq": lin_w(ks[0]), "bq": lin_b(ks[1]),
        "wk": lin_w(ks[2]), "bk": lin_b(ks[3]),
        "wv": lin_w(ks[4]), "bv": lin_b(ks[5]),
        "wo": lin_w(ks[6]), "bo": lin_b(ks[7]),
        "gamma": jnp.ones((hidden,), jnp.float32),
        "beta": jnp.zeros((hidden,), jnp.float32),
    }


# ------------------------------- main ------------------------------------------
if __name__ == "__main__":
    key = jax.random.PRNGKey(0)
    kx, kp = jax.random.split(key)
    x = jax.random.normal(kx, (BATCH, SEQ, HIDDEN), jnp.float32)
    params = make_params(kp, HIDDEN)

    # One-time, init-time packing (hoisted out of the per-call path).
    packed = pack_atten_params(params, batch=BATCH, seq=SEQ)

    ref = atten_block_ref(x, params)
    out = jax.block_until_ready(atten_block(x, packed))

    assert out.shape == (BATCH, SEQ, HIDDEN)
    err = float(jnp.max(jnp.abs(out - ref)))
    assert jnp.allclose(out, ref, atol=1e-4, rtol=1e-4), \
        f"mismatch vs reference (max abs err={err})"
    print("KERNEL_OK")
</pallas_src>

<mosaic_0001>
module attributes {stable_mosaic.version = 11 : i64} {
  func.func @atten_block_kernel(%arg0: memref<16x32xf32, #tpu.memory_space<vmem>>, %arg1: memref<96x96xf32, #tpu.memory_space<vmem>>, %arg2: memref<16x32xf32, #tpu.memory_space<vmem>>) attributes {dimension_semantics = [], scalar_prefetch = 0 : i64, scratch_operands = 0 : i64, tpu.core_type = #tpu.core_type<tc>} {
    %c0 = arith.constant 0 : index
    %c0_0 = arith.constant 0 : index
    %0 = vector.load %arg0[%c0, %c0_0] : memref<16x32xf32, #tpu.memory_space<vmem>>, vector<16x32xf32>
    %c72 = arith.constant 72 : index
    %c0_1 = arith.constant 0 : index
    %1 = vector.load %arg1[%c72, %c0_1] : memref<96x96xf32, #tpu.memory_space<vmem>>, vector<1x32xf32>
    %c73 = arith.constant 73 : index
    %c0_2 = arith.constant 0 : index
    %2 = vector.load %arg1[%c73, %c0_2] : memref<96x96xf32, #tpu.memory_space<vmem>>, vector<1x32xf32>
    %c74 = arith.constant 74 : index
    %c0_3 = arith.constant 0 : index
    %3 = vector.load %arg1[%c74, %c0_3] : memref<96x96xf32, #tpu.memory_space<vmem>>, vector<1x32xf32>
    %cst = arith.constant dense<0.000000e+00> : vector<16xf32>
    %4 = vector.multi_reduction <add>, %0, %cst [1] : vector<16x32xf32> to vector<16xf32>
    %5 = vector.shape_cast %4 : vector<16xf32> to vector<16x1xf32>
    %cst_4 = arith.constant 3.200000e+01 : f32
    %6 = vector.broadcast %cst_4 : f32 to vector<16x1xf32>
    %7 = arith.divf %5, %6 : vector<16x1xf32>
    %8 = vector.broadcast %7 : vector<16x1xf32> to vector<16x32xf32>
    %9 = arith.subf %0, %8 : vector<16x32xf32>
    %10 = arith.mulf %9, %9 : vector<16x32xf32>
    %cst_5 = arith.constant dense<0.000000e+00> : vector<16xf32>
    %11 = vector.multi_reduction <add>, %10, %cst_5 [1] : vector<16x32xf32> to vector<16xf32>
    %12 = vector.shape_cast %11 : vector<16xf32> to vector<16x1xf32>
    %cst_6 = arith.constant 3.100000e+01 : f32
    %13 = vector.broadcast %cst_6 : f32 to vector<16x1xf32>
    %14 = arith.divf %12, %13 : vector<16x1xf32>
    %15 = math.sqrt %14 : vector<16x1xf32>
    %cst_7 = arith.constant 9.99999997E-7 : f32
    %16 = vector.broadcast %cst_7 : f32 to vector<16x1xf32>
    %17 = arith.addf %15, %16 : vector<16x1xf32>
    %cst_8 = arith.constant 1.000000e+00 : f32
    %18 = vector.broadcast %cst_8 : f32 to vector<16x1xf32>
    %19 = arith.divf %18, %17 : vector<16x1xf32>
    %20 = vector.broadcast %1 : vector<1x32xf32> to vector<16x32xf32>
    %21 = vector.broadcast %19 : vector<16x1xf32> to vector<16x32xf32>
    %22 = arith.mulf %20, %21 : vector<16x32xf32>
    %23 = arith.mulf %9, %22 : vector<16x32xf32>
    %24 = vector.broadcast %2 : vector<1x32xf32> to vector<16x32xf32>
    %25 = arith.addf %23, %24 : vector<16x32xf32>
    %c0_9 = arith.constant 0 : index
    %c0_10 = arith.constant 0 : index
    %26 = vector.load %arg1[%c0_9, %c0_10] : memref<96x96xf32, #tpu.memory_space<vmem>>, vector<32x96xf32>
    %c32 = arith.constant 32 : index
    %c0_11 = arith.constant 0 : index
    %27 = vector.load %arg1[%c32, %c0_11] : memref<96x96xf32, #tpu.memory_space<vmem>>, vector<1x96xf32>
    %cst_12 = arith.constant dense<0.000000e+00> : vector<16x96xf32>
    %28 = tpu.matmul %25, %26, %cst_12 {dimension_numbers = #tpu.dot_dimension_numbers<[1], [0], [0], [1], [0, 0, 1, 1], [], []>} : vector<16x32xf32>, vector<32x96xf32>, vector<16x96xf32> -> vector<16x96xf32>
    %29 = vector.broadcast %27 : vector<1x96xf32> to vector<16x96xf32>
    %30 = arith.addf %28, %29 : vector<16x96xf32>
    %c80 = arith.constant 80 : index
    %c0_13 = arith.constant 0 : index
    %31 = vector.load %arg1[%c80, %c0_13] : memref<96x96xf32, #tpu.memory_space<vmem>>, vector<16x16xf32>
    %32 = vector.extract_strided_slice %30 {offsets = [0, 0], sizes = [16, 8], strides = [1, 1]} : vector<16x96xf32> to vector<16x8xf32>
    %33 = vector.extract_strided_slice %30 {offsets = [0, 32], sizes = [16, 8], strides = [1, 1]} : vector<16x96xf32> to vector<16x8xf32>
    %34 = vector.extract_strided_slice %30 {offsets = [0, 64], sizes = [16, 8], strides = [1, 1]} : vector<16x96xf32> to vector<16x8xf32>
    %cst_14 = arith.constant dense<0.000000e+00> : vector<16x16xf32>
    %35 = tpu.matmul %32, %33, %cst_14 {dimension_numbers = #tpu.dot_dimension_numbers<[1], [1], [0], [0], [0, 0, 1, 0], [], []>} : vector<16x8xf32>, vector<16x8xf32>, vector<16x16xf32> -> vector<16x16xf32>
    %cst_15 = arith.constant 0.353553385 : f32
    %36 = vector.broadcast %cst_15 : f32 to vector<16x16xf32>
    %37 = arith.mulf %35, %36 : vector<16x16xf32>
    %38 = arith.addf %37, %31 : vector<16x16xf32>
    %cst_16 = arith.constant dense<0xFF800000> : vector<16xf32>
    %39 = vector.multi_reduction <maximumf>, %38, %cst_16 [1] : vector<16x16xf32> to vector<16xf32>
    %40 = vector.shape_cast %39 : vector<16xf32> to vector<16x1xf32>
    %41 = vector.broadcast %40 : vector<16x1xf32> to vector<16x16xf32>
    %42 = arith.subf %38, %41 : vector<16x16xf32>
    %43 = math.exp %42 : vector<16x16xf32>
    %cst_17 = arith.constant dense<0.000000e+00> : vector<16xf32>
    %44 = vector.multi_reduction <add>, %43, %cst_17 [1] : vector<16x16xf32> to vector<16xf32>
    %45 = vector.shape_cast %44 : vector<16xf32> to vector<16x1xf32>
    %46 = vector.broadcast %45 : vector<16x1xf32> to vector<16x16xf32>
    %47 = arith.divf %43, %46 : vector<16x16xf32>
    %cst_18 = arith.constant dense<0.000000e+00> : vector<16x8xf32>
    %48 = tpu.matmul %47, %34, %cst_18 {dimension_numbers = #tpu.dot_dimension_numbers<[1], [0], [0], [1], [0, 0, 1, 1], [], []>} : vector<16x16xf32>, vector<16x8xf32>, vector<16x8xf32> -> vector<16x8xf32>
    %49 = vector.extract_strided_slice %30 {offsets = [0, 8], sizes = [16, 8], strides = [1, 1]} : vector<16x96xf32> to vector<16x8xf32>
    %50 = vector.extract_strided_slice %30 {offsets = [0, 40], sizes = [16, 8], strides = [1, 1]} : vector<16x96xf32> to vector<16x8xf32>
    %51 = vector.extract_strided_slice %30 {offsets = [0, 72], sizes = [16, 8], strides = [1, 1]} : vector<16x96xf32> to vector<16x8xf32>
    %cst_19 = arith.constant dense<0.000000e+00> : vector<16x16xf32>
    %52 = tpu.matmul %49, %50, %cst_19 {dimension_numbers = #tpu.dot_dimension_numbers<[1], [1], [0], [0], [0, 0, 1, 0], [], []>} : vector<16x8xf32>, vector<16x8xf32>, vector<16x16xf32> -> vector<16x16xf32>
    %cst_20 = arith.constant 0.353553385 : f32
    %53 = vector.broadcast %cst_20 : f32 to vector<16x16xf32>
    %54 = arith.mulf %52, %53 : vector<16x16xf32>
    %55 = arith.addf %54, %31 : vector<16x16xf32>
    %cst_21 = arith.constant dense<0xFF800000> : vector<16xf32>
    %56 = vector.multi_reduction <maximumf>, %55, %cst_21 [1] : vector<16x16xf32> to vector<16xf32>
    %57 = vector.shape_cast %56 : vector<16xf32> to vector<16x1xf32>
    %58 = vector.broadcast %57 : vector<16x1xf32> to vector<16x16xf32>
    %59 = arith.subf %55, %58 : vector<16x16xf32>
    %60 = math.exp %59 : vector<16x16xf32>
    %cst_22 = arith.constant dense<0.000000e+00> : vector<16xf32>
    %61 = vector.multi_reduction <add>, %60, %cst_22 [1] : vector<16x16xf32> to vector<16xf32>
    %62 = vector.shape_cast %61 : vector<16xf32> to vector<16x1xf32>
    %63 = vector.broadcast %62 : vector<16x1xf32> to vector<16x16xf32>
    %64 = arith.divf %60, %63 : vector<16x16xf32>
    %cst_23 = arith.constant dense<0.000000e+00> : vector<16x8xf32>
    %65 = tpu.matmul %64, %51, %cst_23 {dimension_numbers = #tpu.dot_dimension_numbers<[1], [0], [0], [1], [0, 0, 1, 1], [], []>} : vector<16x16xf32>, vector<16x8xf32>, vector<16x8xf32> -> vector<16x8xf32>
    %66 = vector.extract_strided_slice %30 {offsets = [0, 16], sizes = [16, 8], strides = [1, 1]} : vector<16x96xf32> to vector<16x8xf32>
    %67 = vector.extract_strided_slice %30 {offsets = [0, 48], sizes = [16, 8], strides = [1, 1]} : vector<16x96xf32> to vector<16x8xf32>
    %68 = vector.extract_strided_slice %30 {offsets = [0, 80], sizes = [16, 8], strides = [1, 1]} : vector<16x96xf32> to vector<16x8xf32>
    %cst_24 = arith.constant dense<0.000000e+00> : vector<16x16xf32>
    %69 = tpu.matmul %66, %67, %cst_24 {dimension_numbers = #tpu.dot_dimension_numbers<[1], [1], [0], [0], [0, 0, 1, 0], [], []>} : vector<16x8xf32>, vector<16x8xf32>, vector<16x16xf32> -> vector<16x16xf32>
    %cst_25 = arith.constant 0.353553385 : f32
    %70 = vector.broadcast %cst_25 : f32 to vector<16x16xf32>
    %71 = arith.mulf %69, %70 : vector<16x16xf32>
    %72 = arith.addf %71, %31 : vector<16x16xf32>
    %cst_26 = arith.constant dense<0xFF800000> : vector<16xf32>
    %73 = vector.multi_reduction <maximumf>, %72, %cst_26 [1] : vector<16x16xf32> to vector<16xf32>
    %74 = vector.shape_cast %73 : vector<16xf32> to vector<16x1xf32>
    %75 = vector.broadcast %74 : vector<16x1xf32> to vector<16x16xf32>
    %76 = arith.subf %72, %75 : vector<16x16xf32>
    %77 = math.exp %76 : vector<16x16xf32>
    %cst_27 = arith.constant dense<0.000000e+00> : vector<16xf32>
    %78 = vector.multi_reduction <add>, %77, %cst_27 [1] : vector<16x16xf32> to vector<16xf32>
    %79 = vector.shape_cast %78 : vector<16xf32> to vector<16x1xf32>
    %80 = vector.broadcast %79 : vector<16x1xf32> to vector<16x16xf32>
    %81 = arith.divf %77, %80 : vector<16x16xf32>
    %cst_28 = arith.constant dense<0.000000e+00> : vector<16x8xf32>
    %82 = tpu.matmul %81, %68, %cst_28 {dimension_numbers = #tpu.dot_dimension_numbers<[1], [0], [0], [1], [0, 0, 1, 1], [], []>} : vector<16x16xf32>, vector<16x8xf32>, vector<16x8xf32> -> vector<16x8xf32>
    %83 = vector.extract_strided_slice %30 {offsets = [0, 24], sizes = [16, 8], strides = [1, 1]} : vector<16x96xf32> to vector<16x8xf32>
    %84 = vector.extract_strided_slice %30 {offsets = [0, 56], sizes = [16, 8], strides = [1, 1]} : vector<16x96xf32> to vector<16x8xf32>
    %85 = vector.extract_strided_slice %30 {offsets = [0, 88], sizes = [16, 8], strides = [1, 1]} : vector<16x96xf32> to vector<16x8xf32>
    %cst_29 = arith.constant dense<0.000000e+00> : vector<16x16xf32>
    %86 = tpu.matmul %83, %84, %cst_29 {dimension_numbers = #tpu.dot_dimension_numbers<[1], [1], [0], [0], [0, 0, 1, 0], [], []>} : vector<16x8xf32>, vector<16x8xf32>, vector<16x16xf32> -> vector<16x16xf32>
    %cst_30 = arith.constant 0.353553385 : f32
    %87 = vector.broadcast %cst_30 : f32 to vector<16x16xf32>
    %88 = arith.mulf %86, %87 : vector<16x16xf32>
    %89 = arith.addf %88, %31 : vector<16x16xf32>
    %cst_31 = arith.constant dense<0xFF800000> : vector<16xf32>
    %90 = vector.multi_reduction <maximumf>, %89, %cst_31 [1] : vector<16x16xf32> to vector<16xf32>
    %91 = vector.shape_cast %90 : vector<16xf32> to vector<16x1xf32>
    %92 = vector.broadcast %91 : vector<16x1xf32> to vector<16x16xf32>
    %93 = arith.subf %89, %92 : vector<16x16xf32>
    %94 = math.exp %93 : vector<16x16xf32>
    %cst_32 = arith.constant dense<0.000000e+00> : vector<16xf32>
    %95 = vector.multi_reduction <add>, %94, %cst_32 [1] : vector<16x16xf32> to vector<16xf32>
    %96 = vector.shape_cast %95 : vector<16xf32> to vector<16x1xf32>
    %97 = vector.broadcast %96 : vector<16x1xf32> to vector<16x16xf32>
    %98 = arith.divf %94, %97 : vector<16x16xf32>
    %cst_33 = arith.constant dense<0.000000e+00> : vector<16x8xf32>
    %99 = tpu.matmul %98, %85, %cst_33 {dimension_numbers = #tpu.dot_dimension_numbers<[1], [0], [0], [1], [0, 0, 1, 1], [], []>} : vector<16x16xf32>, vector<16x8xf32>, vector<16x8xf32> -> vector<16x8xf32>
    %100 = tpu.concatenate %48, %65, %82, %99 in 1 : vector<16x8xf32>, vector<16x8xf32>, vector<16x8xf32>, vector<16x8xf32> -> vector<16x32xf32>
    %c40 = arith.constant 40 : index
    %c0_34 = arith.constant 0 : index
    %101 = vector.load %arg1[%c40, %c0_34] : memref<96x96xf32, #tpu.memory_space<vmem>>, vector<32x32xf32>
    %cst_35 = arith.constant dense<0.000000e+00> : vector<16x32xf32>
    %102 = tpu.matmul %100, %101, %cst_35 {dimension_numbers = #tpu.dot_dimension_numbers<[1], [0], [0], [1], [0, 0, 1, 1], [], []>} : vector<16x32xf32>, vector<32x32xf32>, vector<16x32xf32> -> vector<16x32xf32>
    %103 = vector.broadcast %3 : vector<1x32xf32> to vector<16x32xf32>
    %104 = arith.addf %102, %103 : vector<16x32xf32>
    %105 = arith.addf %0, %104 : vector<16x32xf32>
    %c0_36 = arith.constant 0 : index
    %c0_37 = arith.constant 0 : index
    %106 = vector.load %arg2[%c0_36, %c0_37] : memref<16x32xf32, #tpu.memory_space<vmem>>, vector<16x32xf32>
    tpu.vector_store %arg2[%c0_36, %c0_37], %105 {strides = array<i32>} : memref<16x32xf32, #tpu.memory_space<vmem>>, vector<16x32xf32>,
    return
  }
}

</mosaic_0001>

<bundles_post_ra>
// kernel: tpu_custom_call.1
= control target key start
LH: loop header
LB: loop body
LE: loop exit
PB: predicated region body
PF: predicated region fallthrough
CT: control target
= control target key end

     0   :  { %7 = vsyncpa [#allocation3], 0  ;;  %s1607_s0 = inlined_call_operand.hbm [shape: f32[16,32], index: 0, kind: input, shape index: {}, may-alias: {0,2}]   ;;  %s1608_s1 = inlined_call_operand.hbm [shape: f32[96,96], index: 1, kind: input, shape index: {}]   ;;  %s1609_s2 = inlined_call_operand.hbm [shape: f32[16,32], index: 2, kind: output, shape index: {}, may-alias: {0,2}]  }
   0x1   :  { %8 = vsyncpa [#allocation6], 0 }
   0x2   :  { %9 = vsyncpa [#allocation4], 0  ;;  %s1430_s9 = smov [#allocation2]  }
   0x3   :  { %s15_s10 = sshll.u32 %s1430_s9, 4  ;;  %s16_s10 = int_to_ptr.vmem [resolvable:$true] %s15_s10 }
   0x4   :  { %s1372_s11 = scalar_lea.vmem %s16_s10, 256  ;;  %p1377_p1 = scmp.lt.s32.totalorder %s16_s10, %s16_s10 }
   0x5   :  { %p1373_p0 = scmp.ne.s32.totalorder %s16_s10, %s1372_s11  ;;  %p1378_p2 = scmp.lt.s32.totalorder %s1372_s11, %s1372_s11 }
   0x7   :  { %p1379_p3 = por %p1378_p2, %p1377_p1 }
   0x9   :  { %p1380_p4 = pnand %p1379_p3, %p1373_p0 }
   0xb   :  { %1383 = shalt.err (!%p1380_p4)
}
   0xc   :  { %s1431_s12 = smov 128   ;;  %s1432_s13 = smov 8  }
   0xd   :  { %21 = dma.hbm_to_vmem [thread:$0]  %s1607_s0, 256, %s16_s10, [#allocation3], %s1431_s12, %s1431_s12, %s1432_s13  }
   0xe   :  { %s1433_s16 = smov [#allocation5]  }
   0xf   :  { %s27_s17 = sshll.u32 %s1433_s16, 4  ;;  %s28_s17 = int_to_ptr.vmem [resolvable:$true] %s27_s17 }
  0x10   :  { %s1392_s18 = scalar_lea.vmem %s28_s17, 1536  ;;  %p1397_p6 = scmp.lt.s32.totalorder %s28_s17, %s28_s17 }
  0x11   :  { %p1393_p5 = scmp.ne.s32.totalorder %s28_s17, %s1392_s18  ;;  %p1398_p7 = scmp.lt.s32.totalorder %s1392_s18, %s1392_s18 }
  0x13   :  { %p1399_p8 = por %p1398_p7, %p1397_p6 }
  0x15   :  { %p1400_p9 = pnand %p1399_p8, %p1393_p5 }
  0x17   :  { %1403 = shalt.err (!%p1400_p9)
}
  0x18   :  { %33 = dma.hbm_to_vmem [thread:$0]  %s1608_s1, 1536, %s28_s17, [#allocation6], %s1431_s12, %s1431_s12, %s1432_s13  }
  0x19   :  { %1424 = dma.done.wait [#allocation3], 256  }
  0x1a   :  { %1425 = vsyncadd [#allocation3], 4294967040 }
  0x1b   :  { %1426 = dma.done.wait [#allocation6], 1536  }
  0x1c   :  { %1427 = vsyncadd [#allocation6], 4294965760  ;;  %vm45_vm0 = vcmask 261120   ;;  %v1475_v0 = vld [vmem:[#allocation2] sm:$0xff]  ;;  %v1477_v1 = vld [vmem:[#allocation2 + $0x8] sm:$0xff]  ;;  %vm200_vm5 = vcmask 64512  }
  0x1d   :  { %v46_v2 = vsel %vm45_vm0, %v1475_v0, 0.0  ;;  %v49_v3 = vsel %vm45_vm0, %v1477_v1, 0.0  ;;  %v105_v14 = vld [vmem:[#allocation5 + $0x18] sm:$0xff]  ;;  %v104_v15 = vld [vmem:[#allocation5 + $0x10] sm:$0xff]  ;;  %v103_v16 = vld [vmem:[#allocation5 + $0x8] sm:$0xff]  ;;  %s1434_s0 = smov 96  }
  0x1e   :  { %47 = vadd.xlane.f32.xlu0 %v46_v2  ;;  %1228 = vmatprep.subr.mxu0 %v105_v14  ;;  %v102_v17 = vld [vmem:[#allocation5] sm:$0xff]  ;;  %v1152_v34 = vld [vmem:[#allocation5 + $0x48] ss:$0 sm:$0xff]  ;;  %v1153_v37 = vld [vmem:[#allocation5 + $0x49] ss:$0 sm:$0xff]  ;;  %vm288_vm6 = vcmask 130048  }
  0x1f   :  { %1229 = vmatpush3.msra.mxu0 %v105_v14  ;;  %v1154_v44 = vld [vmem:[#allocation5 + $0x20] ss:$0 sm:$0xff]  ;;  %v1503_v52 = vld [vmem:[#allocation5 + $0x58] sm:$0xff]  ;;  %v1505_v55 = vld [vmem:[#allocation5 + $0x50] sm:$0xff]  ;;  %s1435_s1 = smov 64   ;;  %s1436_s21 = smov 88  }
  0x20   :  { %1230 = vmatprep.subr.mxu0 %v104_v15  ;;  %s1437_s22 = smov 120   ;;  %s1438_s23 = smov 56   ;;  %vm1038_vm7 = vcmask 195584  }
  0x21   :  { %1231 = vmatpush3.msra.mxu0 %v104_v15  ;;  %s1439_s24 = smov 80   ;;  %s1440_s25 = smov 112  }
  0x22   :  { %50 = vadd.xlane.f32.xlu0 %v49_v3  ;;  %1232 = vmatprep.subr.mxu0 %v103_v16  ;;  %s1441_s26 = smov 48   ;;  %s1442_s27 = smov 72  }
  0x23   :  { %1233 = vmatpush3.msra.mxu0 %v103_v16  ;;  %s1443_s28 = smov 104   ;;  %s1444_s29 = smov 40  }
  0x24   :  { %1234 = vmatprep.subr.mxu0 %v102_v17  ;;  %s1445_s30 = smov 16   ;;  %s1446_s3 = smov 24  }
  0x25   :  { %1235 = vmatpush3.msra.mxu0 %v102_v17  ;;  %s1447_s4 = smov [#allocation7]  }
  0x26   :  { %s1139_s5 = sshll.u32 %s1447_s4, 4  ;;  %s1140_s5 = int_to_ptr.vmem [resolvable:$true] %s1139_s5 }
  0x27   :  { %s1404_s6 = scalar_lea.vmem %s1140_s5, 256  ;;  %p1409_p11 = scmp.lt.s32.totalorder %s1140_s5, %s1140_s5 }
  0x28   :  { %p1405_p10 = scmp.ne.s32.totalorder %s1140_s5, %s1404_s6  ;;  %p1410_p12 = scmp.lt.s32.totalorder %s1404_s6, %s1404_s6 }
  0x2a   :  { %p1411_p13 = por %p1410_p12, %p1409_p11 }
  0x2c   :  { %p1412_p0 = pnand %p1411_p13, %p1405_p10 }
  0xa7   :  { %v48_v4 = vpop.xlane.xlu0 %47 }
  0xa8   :  { %v53_v5 = vmul.f32 0.03125, %v48_v4 }
  0xaa   :  { %v55_v6 = vsub.f32 %v1475_v0, %v53_v5 }
  0xab   :  { %v51_v7 = vpop.xlane.xlu0 %50 }
  0xac   :  { %v54_v8 = vmul.f32 0.03125, %v51_v7  ;;  %v57_v9 = vmul.f32 %v55_v6, %v55_v6 }
  0xae   :  { %v56_v10 = vsub.f32 %v1477_v1, %v54_v8  ;;  %v59_v11 = vsel %vm45_vm0, %v57_v9, 0.0 }
  0xaf   :  { %60 = vadd.xlane.f32.xlu1 %v59_v11 }
  0xb0   :  { %v58_v12 = vmul.f32 %v56_v10, %v56_v10 }
  0xb2   :  { %v62_v13 = vsel %vm45_vm0, %v58_v12, 0.0 }
  0xb3   :  { %63 = vadd.xlane.f32.xlu1 %v62_v13 }
 0x138   :  { %v61_v18 = vpop.xlane.xlu1 %60 }
 0x139   :  { %v66_v19 = vmul.f32 0.032258064, %v61_v18 }
 0x13b   :  { %1324 = vrsqrt.f32 %v66_v19  ;;  %vm70_vm1 = vcmp.eq.f32.partialorder %v66_v19, inf  ;;  %v73_v24 = vand.u32 2147483648, %v66_v19  ;;  %vm72_vm2 = vcmp.eq.f32.partialorder %v66_v19, 0.0 }
 0x13c   :  { %v64_v20 = vpop.xlane.xlu1 %63 }
 0x13d   :  { %v67_v21 = vmul.f32 0.032258064, %v64_v20 }
 0x13f   :  { %1326 = vrsqrt.f32 %v67_v21  ;;  %vm77_vm3 = vcmp.eq.f32.partialorder %v67_v21, inf  ;;  %v80_v30 = vand.u32 2147483648, %v67_v21  ;;  %vm79_vm4 = vcmp.eq.f32.partialorder %v67_v21, 0.0 }
 0x148   :  { %v1325_v22 = vpop.eup %1324 }
 0x149   :  { %v69_v23 = vmul.f32 %v1325_v22, %v66_v19 }
 0x14b   :  { %v71_v25 = vsel %vm70_vm1, %v66_v19, %v69_v23 }
 0x14c   :  { %v1327_v26 = vpop.eup %1326  ;;  %v74_v27 = vsel %vm72_vm2, %v73_v24, %v71_v25 }
 0x14d   :  { %v76_v28 = vmul.f32 %v1327_v26, %v67_v21  ;;  %v82_v29 = vadd.f32 1e-06, %v74_v27 }
 0x14f   :  { %v78_v31 = vsel %vm77_vm3, %v67_v21, %v76_v28  ;;  %1328 = vrcp.f32 %v82_v29 }
 0x150   :  { %v81_v32 = vsel %vm79_vm4, %v80_v30, %v78_v31 }
 0x151   :  { %v83_v33 = vadd.f32 1e-06, %v81_v32 }
 0x153   :  { %1330 = vrcp.f32 %v83_v33 }
 0x15c   :  { %v1329_v35 = vpop.eup %1328 }
 0x15d   :  { %v92_v36 = vmul.f32 %v1329_v35, %v1152_v34 }
 0x15f   :  { %v94_v38 = vmul.f32 %v92_v36, %v55_v6 }
 0x160   :  { %v1331_v39 = vpop.eup %1330 }
 0x161   :  { %v93_v40 = vmul.f32 %v1331_v39, %v1152_v34  ;;  %v100_v41 = vadd.f32 %v1153_v37, %v94_v38 }
 0x163   :  { %v95_v42 = vmul.f32 %v93_v40, %v56_v10  ;;  %1236 = vmatprep.mubr.msk.f32.mxu0 %vm45_vm0, %v100_v41 }
 0x165   :  { %v101_v43 = vadd.f32 %v1153_v37, %v95_v42 }
 0x167   :  { %1237 = vmatmul.mubr.msk.f32.vlgmr.msra.gmra.mxu0 %vm45_vm0, %v101_v43 }
 0x227   :  { %v1238_v45 = vpop.f32.mrf.mxu0 }
 0x228   :  { %v1489_v46 = vadd.f32 %v1238_v45, %v1154_v44 }
 0x229   :  { %v183_v47 = vpop.f32.mrf.mxu0 }
 0x22a   :  { %v1491_v48 = vadd.f32 %v1154_v44, %v183_v47  ;;  %198 = vrot.lane.b32.xlu0 %v1489_v46, %s1434_s0 }
 0x22c   :  { %196 = vrot.lane.b32.xlu1 %v1491_v48, %s1434_s0  ;;  %1243 = vmatprep.mubr.msk.f32.mxu1 %vm200_vm5, %v1491_v48 }
 0x29c   :  { %v199_v49 = vpop.permute.xlu0 %198 }
 0x29d   :  { %1239 = vmatprep.subr.msk.mxu1 %vm200_vm5, %v199_v49 }
 0x29e   :  { %1240 = vmatpush3.xpose.msk.msra.mxu1 %vm200_vm5, %v199_v49  ;;  %v197_v50 = vpop.permute.xlu1 %196 }
 0x29f   :  { %1241 = vmatprep.subr.msk.mxu1 %vm200_vm5, %v197_v50 }
 0x2a2   :  { %1242 = vmatpush3.xpose.msk.msra.mxu1 %vm200_vm5, %v197_v50 }
 0x2a5   :  { %1244 = vmatmul.mubr.msk.f32.vlgmr.msra.gmra.mxu1 %vm200_vm5, %v1489_v46 }
 0x365   :  { %v1245_v51 = vpop.f32.mrf.mxu1 }
 0x366   :  { %v285_v53 = vmul.f32 0.35355338, %v1245_v51 }
 0x367   :  { %v275_v54 = vpop.f32.mrf.mxu1 }
 0x368   :  { %v284_v56 = vmul.f32 0.35355338, %v275_v54  ;;  %v287_v57 = vadd.f32 %v285_v53, %v1503_v52 }
 0x36a   :  { %v292_v58 = vsel %vm288_vm6, %v287_v57, -inf  ;;  %v286_v59 = vadd.f32 %v284_v56, %v1505_v55 }
 0x36b   :  { %293 = vmax.xlane.f32.xlu0 %v292_v58 }
 0x36c   :  { %v289_v60 = vsel %vm288_vm6, %v286_v59, -inf }
 0x36d   :  { %290 = vmax.xlane.f32.xlu1 %v289_v60 }
 0x3f4   :  { %v294_v61 = vpop.xlane.xlu0 %293 }
 0x3f5   :  { %v296_v62 = vsub.f32 %v287_v57, %v294_v61 }
 0x3f6   :  { %v291_v63 = vpop.xlane.xlu1 %290 }
 0x3f7   :  { %v299_v2 = vmul.f32 1.442695, %v296_v62  ;;  %v295_v3 = vsub.f32 %v286_v59, %v291_v63 }
 0x3f9   :  { %1332 = vpow2.f32 %v299_v2  ;;  %v297_v4 = vmul.f32 1.442695, %v295_v3 }
 0x3fb   :  { %1334 = vpow2.f32 %v297_v4 }
 0x406   :  { %v1333_v5 = vpop.eup %1332 }
 0x407   :  { %v304_v6 = vsel %vm288_vm6, %v1333_v5, 0.0 }
 0x408   :  { %v1335_v7 = vpop.eup %1334  ;;  %305 = vadd.xlane.f32.xlu1 %v304_v6 }
 0x409   :  { %v301_v8 = vsel %vm288_vm6, %v1335_v7, 0.0 }
 0x40a   :  { %302 = vadd.xlane.f32.xlu0 %v301_v8 }
 0x419   :  { %311 = vrot.lane.b32.xlu1 %v1491_v48, %s1435_s1 }
 0x41d   :  { %404 = vrot.lane.b32.xlu1 %v1489_v46, %s1436_s21 }
 0x420   :  { %313 = vrot.lane.b32.xlu0 %v1489_v46, %s1435_s1 }
 0x421   :  { %402 = vrot.lane.b32.xlu1 %v1491_v48, %s1436_s21 }
 0x424   :  { %398 = vrot.lane.b32.xlu0 %v1491_v48, %s1437_s22 }
 0x425   :  { %400 = vrot.lane.b32.xlu1 %v1489_v46, %s1437_s22 }
 0x491   :  { %v306_v9 = vpop.xlane.xlu1 %305 }
 0x492   :  { %1336 = vrcp.f32 %v306_v9 }
 0x493   :  { %v303_v10 = vpop.xlane.xlu0 %302 }
 0x494   :  { %1338 = vrcp.f32 %v303_v10 }
 0x495   :  { %v312_v11 = vpop.permute.xlu1 %311 }
 0x497   :  { %v314_v12 = vpop.permute.xlu0 %313 }
 0x498   :  { %1246 = vmatprep.subr.mxu1 %v314_v12 }
 0x499   :  { %1247 = vmatpush3.msra.mxu1 %v314_v12  ;;  %v405_v13 = vpop.permute.xlu1 %404 }
 0x49a   :  { %1248 = vmatprep.subr.mxu1 %v312_v11 }
 0x49b   :  { %1249 = vmatpush3.msra.mxu1 %v312_v11  ;;  %v399_v18 = vpop.permute.xlu0 %398 }
 0x49c   :  { %1253 = vmatprep.subr.msk.mxu1 %vm200_vm5, %v405_v13 }
 0x49d   :  { %v403_v19 = vpop.permute.xlu1 %402 }
 0x49f   :  { %v1337_v14 = vpop.eup %1336 }
 0x4a0   :  { %v310_v17 = vmul.f32 %v1337_v14, %v1333_v5 }
 0x4a1   :  { %v1339_v15 = vpop.eup %1338  ;;  %v401_v20 = vpop.permute.xlu1 %400 }
 0x4a2   :  { %v308_v16 = vmul.f32 %v1339_v15, %v1335_v7 }
 0x4a4   :  { %1250 = vmatprep.mubr.msk.f32.mxu1 %vm288_vm6, %v308_v16 }
 0x4a5   :  { %1251 = vmatmul.mubr.msk.f32.vlgmr.msra.gmra.mxu1 %vm288_vm6, %v310_v17 }
 0x4a6   :  { %1254 = vmatpush3.xpose.msk.msra.mxu1 %vm200_vm5, %v405_v13  ;;  %1257 = vmatprep.mubr.msk.f32.mxu1 %vm200_vm5, %v399_v18 }
 0x4a7   :  { %1255 = vmatprep.subr.msk.mxu1 %vm200_vm5, %v403_v19 }
 0x4aa   :  { %1256 = vmatpush3.xpose.msk.msra.mxu1 %vm200_vm5, %v403_v19 }
 0x4ad   :  { %1258 = vmatmul.mubr.msk.f32.vlgmr.msra.gmra.mxu1 %vm200_vm5, %v401_v20 }
 0x565   :  { %v1527_v21 = vpop.f32.mrf.mxu1 }
 0x567   :  { %v1529_v22 = vpop.f32.mrf.mxu1 }
 0x56d   :  { %v1259_v23 = vpop.f32.mrf.mxu1 }
 0x56e   :  { %v490_v24 = vmul.f32 0.35355338, %v1259_v23 }
 0x56f   :  { %v480_v25 = vpop.f32.mrf.mxu1 }
 0x570   :  { %v489_v26 = vmul.f32 0.35355338, %v480_v25  ;;  %v492_v27 = vadd.f32 %v490_v24, %v1503_v52 }
 0x572   :  { %v496_v28 = vsel %vm288_vm6, %v492_v27, -inf  ;;  %v491_v29 = vadd.f32 %v489_v26, %v1505_v55 }
 0x573   :  { %497 = vmax.xlane.f32.xlu1 %v496_v28 }
 0x574   :  { %v493_v30 = vsel %vm288_vm6, %v491_v29, -inf }
 0x575   :  { %494 = vmax.xlane.f32.xlu0 %v493_v30 }
 0x584   :  { %515 = vrot.lane.b32.xlu1 %v1491_v48, %s1438_s23 }
 0x588   :  { %608 = vrot.lane.b32.xlu1 %v1489_v46, %s1439_s24 }
 0x58c   :  { %606 = vrot.lane.b32.xlu1 %v1491_v48, %s1439_s24 }
 0x590   :  { %604 = vrot.lane.b32.xlu1 %v1489_v46, %s1440_s25 }
 0x5fc   :  { %v498_v31 = vpop.xlane.xlu1 %497 }
 0x5fd   :  { %v500_v32 = vsub.f32 %v492_v27, %v498_v31 }
 0x5fe   :  { %v495_v33 = vpop.xlane.xlu0 %494 }
 0x5ff   :  { %v503_v34 = vmul.f32 1.442695, %v500_v32  ;;  %v499_v35 = vsub.f32 %v491_v29, %v495_v33 }
 0x600   :  { %v516_v43 = vpop.permute.xlu1 %515 }
 0x601   :  { %1340 = vpow2.f32 %v503_v34  ;;  %v501_v36 = vmul.f32 1.442695, %v499_v35 }
 0x603   :  { %1342 = vpow2.f32 %v501_v36 }
 0x604   :  { %v609_v45 = vpop.permute.xlu1 %608 }
 0x608   :  { %v607_v54 = vpop.permute.xlu1 %606 }
 0x60c   :  { %v605_v56 = vpop.permute.xlu1 %604 }
 0x60e   :  { %v1341_v37 = vpop.eup %1340 }
 0x60f   :  { %v508_v38 = vsel %vm288_vm6, %v1341_v37, 0.0 }
 0x610   :  { %v1343_v39 = vpop.eup %1342  ;;  %509 = vadd.xlane.f32.xlu0 %v508_v38 }
 0x611   :  { %v505_v40 = vsel %vm288_vm6, %v1343_v39, 0.0 }
 0x614   :  { %506 = vadd.xlane.f32.xlu0 %v505_v40 }
 0x62a   :  { %517 = vrot.lane.b32.xlu0 %v1489_v46, %s1438_s23 }
 0x62e   :  { %602 = vrot.lane.b32.xlu0 %v1491_v48, %s1440_s25 }
 0x699   :  { %v510_v41 = vpop.xlane.xlu0 %509 }
 0x69a   :  { %1344 = vrcp.f32 %v510_v41 }
 0x69d   :  { %v507_v42 = vpop.xlane.xlu0 %506 }
 0x69e   :  { %1346 = vrcp.f32 %v507_v42 }
 0x6a1   :  { %v518_v44 = vpop.permute.xlu0 %517 }
 0x6a2   :  { %1260 = vmatprep.subr.mxu0 %v518_v44 }
 0x6a3   :  { %1261 = vmatpush3.msra.mxu0 %v518_v44 }
 0x6a4   :  { %1262 = vmatprep.subr.mxu0 %v516_v43 }
 0x6a5   :  { %1263 = vmatpush3.msra.mxu0 %v516_v43  ;;  %v603_v53 = vpop.permute.xlu0 %602 }
 0x6a6   :  { %1267 = vmatprep.subr.msk.mxu0 %vm200_vm5, %v609_v45 }
 0x6a7   :  { %v1345_v47 = vpop.eup %1344 }
 0x6a8   :  { %v514_v51 = vmul.f32 %v1345_v47, %v1341_v37 }
 0x6ab   :  { %v1347_v49 = vpop.eup %1346 }
 0x6ac   :  { %v512_v50 = vmul.f32 %v1347_v49, %v1343_v39 }
 0x6ae   :  { %1264 = vmatprep.mubr.msk.f32.mxu0 %vm288_vm6, %v512_v50 }
 0x6af   :  { %1265 = vmatmul.mubr.msk.f32.vlgmr.msra.gmra.mxu0 %vm288_vm6, %v514_v51 }
 0x6b0   :  { %1268 = vmatpush3.xpose.msk.msra.mxu0 %vm200_vm5, %v609_v45  ;;  %1271 = vmatprep.mubr.msk.f32.mxu0 %vm200_vm5, %v603_v53 }
 0x6b1   :  { %1269 = vmatprep.subr.msk.mxu0 %vm200_vm5, %v607_v54 }
 0x6b4   :  { %1270 = vmatpush3.xpose.msk.msra.mxu0 %vm200_vm5, %v607_v54 }
 0x6b7   :  { %1272 = vmatmul.mubr.msk.f32.vlgmr.msra.gmra.mxu0 %vm200_vm5, %v605_v56 }
 0x76f   :  { %v1551_v57 = vpop.f32.mrf.mxu0 }
 0x771   :  { %v1553_v58 = vpop.f32.mrf.mxu0 }
 0x777   :  { %v1273_v59 = vpop.f32.mrf.mxu0 }
 0x778   :  { %v694_v60 = vmul.f32 0.35355338, %v1273_v59  ;;  %v1042_v59 = vld [vmem:[#allocation5 + $0x30] sm:$0xff] }
 0x779   :  { %v684_v61 = vpop.f32.mrf.mxu0 }
 0x77a   :  { %v693_v62 = vmul.f32 0.35355338, %v684_v61  ;;  %v696_v63 = vadd.f32 %v694_v60, %v1503_v52  ;;  %v1041_v60 = vld [vmem:[#allocation5 + $0x28] sm:$0xff] }
 0x77c   :  { %v700_v2 = vsel %vm288_vm6, %v696_v63, -inf  ;;  %v695_v3 = vadd.f32 %v693_v62, %v1505_v55 }
 0x77d   :  { %701 = vmax.xlane.f32.xlu1 %v700_v2 }
 0x77e   :  { %v697_v4 = vsel %vm288_vm6, %v695_v3, -inf }
 0x77f   :  { %698 = vmax.xlane.f32.xlu0 %v697_v4 }
 0x78e   :  { %719 = vrot.lane.b32.xlu1 %v1491_v48, %s1441_s26 }
 0x792   :  { %812 = vrot.lane.b32.xlu1 %v1489_v46, %s1442_s27 }
 0x796   :  { %810 = vrot.lane.b32.xlu1 %v1491_v48, %s1442_s27 }
 0x79a   :  { %808 = vrot.lane.b32.xlu1 %v1489_v46, %s1443_s28 }
 0x806   :  { %v702_v5 = vpop.xlane.xlu1 %701 }
 0x807   :  { %v704_v6 = vsub.f32 %v696_v63, %v702_v5 }
 0x808   :  { %v699_v7 = vpop.xlane.xlu0 %698 }
 0x809   :  { %v707_v8 = vmul.f32 1.442695, %v704_v6  ;;  %v703_v9 = vsub.f32 %v695_v3, %v699_v7 }
 0x80a   :  { %v720_v17 = vpop.permute.xlu1 %719 }
 0x80b   :  { %1348 = vpow2.f32 %v707_v8  ;;  %v705_v10 = vmul.f32 1.442695, %v703_v9 }
 0x80d   :  { %1350 = vpow2.f32 %v705_v10 }
 0x80e   :  { %v813_v19 = vpop.permute.xlu1 %812 }
 0x812   :  { %v811_v27 = vpop.permute.xlu1 %810 }
 0x816   :  { %v809_v28 = vpop.permute.xlu1 %808 }
 0x818   :  { %v1349_v11 = vpop.eup %1348 }
 0x819   :  { %v712_v12 = vsel %vm288_vm6, %v1349_v11, 0.0 }
 0x81a   :  { %v1351_v13 = vpop.eup %1350  ;;  %713 = vadd.xlane.f32.xlu0 %v712_v12 }
 0x81b   :  { %v709_v14 = vsel %vm288_vm6, %v1351_v13, 0.0 }
 0x81e   :  { %710 = vadd.xlane.f32.xlu0 %v709_v14 }
 0x834   :  { %721 = vrot.lane.b32.xlu0 %v1489_v46, %s1441_s26 }
 0x838   :  { %806 = vrot.lane.b32.xlu0 %v1491_v48, %s1443_s28 }
 0x8a3   :  { %v714_v15 = vpop.xlane.xlu0 %713 }
 0x8a4   :  { %1352 = vrcp.f32 %v714_v15 }
 0x8a7   :  { %v711_v16 = vpop.xlane.xlu0 %710 }
 0x8a8   :  { %1354 = vrcp.f32 %v711_v16 }
 0x8ab   :  { %v722_v18 = vpop.permute.xlu0 %721 }
 0x8ac   :  { %1274 = vmatprep.subr.mxu1 %v722_v18 }
 0x8ad   :  { %1275 = vmatpush3.msra.mxu1 %v722_v18 }
 0x8ae   :  { %1276 = vmatprep.subr.mxu1 %v720_v17 }
 0x8af   :  { %1277 = vmatpush3.msra.mxu1 %v720_v17  ;;  %v807_v26 = vpop.permute.xlu0 %806 }
 0x8b0   :  { %1281 = vmatprep.subr.msk.mxu1 %vm200_vm5, %v813_v19 }
 0x8b1   :  { %v1353_v20 = vpop.eup %1352 }
 0x8b2   :  { %v718_v25 = vmul.f32 %v1353_v20, %v1349_v11 }
 0x8b5   :  { %v1355_v23 = vpop.eup %1354 }
 0x8b6   :  { %v716_v24 = vmul.f32 %v1355_v23, %v1351_v13  ;;  %v1181_v13 = vld [vmem:[#allocation5 + $0x4a] ss:$0 sm:$0xff] }
 0x8b8   :  { %1278 = vmatprep.mubr.msk.f32.mxu1 %vm288_vm6, %v716_v24 }
 0x8b9   :  { %1279 = vmatmul.mubr.msk.f32.vlgmr.msra.gmra.mxu1 %vm288_vm6, %v718_v25 }
 0x8ba   :  { %1282 = vmatpush3.xpose.msk.msra.mxu1 %vm200_vm5, %v813_v19  ;;  %1285 = vmatprep.mubr.msk.f32.mxu1 %vm200_vm5, %v807_v26 }
 0x8bb   :  { %1283 = vmatprep.subr.msk.mxu1 %vm200_vm5, %v811_v27 }
 0x8be   :  { %1284 = vmatpush3.xpose.msk.msra.mxu1 %vm200_vm5, %v811_v27 }
 0x8c1   :  { %1286 = vmatmul.mubr.msk.f32.vlgmr.msra.gmra.mxu1 %vm200_vm5, %v809_v28 }
 0x979   :  { %v1280_v29 = vpop.f32.mrf.mxu1 }
 0x97b   :  { %v797_v30 = vpop.f32.mrf.mxu1 }
 0x981   :  { %v1287_v31 = vpop.f32.mrf.mxu1 }
 0x982   :  { %v898_v32 = vmul.f32 0.35355338, %v1287_v31 }
 0x983   :  { %v888_v33 = vpop.f32.mrf.mxu1 }
 0x984   :  { %v897_v34 = vmul.f32 0.35355338, %v888_v33  ;;  %v900_v35 = vadd.f32 %v898_v32, %v1503_v52 }
 0x986   :  { %v899_v36 = vadd.f32 %v897_v34, %v1505_v55  ;;  %v904_v37 = vsel %vm288_vm6, %v900_v35, -inf }
 0x987   :  { %905 = vmax.xlane.f32.xlu1 %v904_v37 }
 0x988   :  { %v901_v38 = vsel %vm288_vm6, %v899_v36, -inf }
 0x989   :  { %902 = vmax.xlane.f32.xlu0 %v901_v38 }
 0x998   :  { %923 = vrot.lane.b32.xlu1 %v1491_v48, %s1444_s29 }
 0x99c   :  { %1012 = vrot.lane.b32.xlu1 %v1553_v58, %s1432_s13  ;;  %v1043_v58 = vld [vmem:[#allocation5 + $0x38] sm:$0xff] }
 0x9a0   :  { %1014 = vrot.lane.b32.xlu1 %v1551_v57, %s1432_s13 }
 0x9a4   :  { %1022 = vrot.lane.b32.xlu1 %v1280_v29, %s1445_s30 }
 0xa10   :  { %v906_v52 = vpop.xlane.xlu1 %905 }
 0xa11   :  { %v908_v39 = vsub.f32 %v900_v35, %v906_v52 }
 0xa12   :  { %v903_v55 = vpop.xlane.xlu0 %902 }
 0xa13   :  { %v911_v40 = vmul.f32 1.442695, %v908_v39  ;;  %v907_v41 = vsub.f32 %v899_v36, %v903_v55 }
 0xa14   :  { %v924_v51 = vpop.permute.xlu1 %923 }
 0xa15   :  { %1356 = vpow2.f32 %v911_v40  ;;  %v909_v42 = vmul.f32 1.442695, %v907_v41 }
 0xa17   :  { %1358 = vpow2.f32 %v909_v42 }
 0xa18   :  { %v1013_v63 = vpop.permute.xlu1 %1012 }
 0xa19   :  { %v1034_v5 = vsel %vm200_vm5, %v1529_v22, %v1013_v63 }
 0xa1c   :  { %v1015_v2 = vpop.permute.xlu1 %1014 }
 0xa1d   :  { %v1035_v7 = vsel %vm200_vm5, %v1527_v21, %v1015_v2 }
 0xa20   :  { %v1023_v3 = vpop.permute.xlu1 %1022 }
 0xa21   :  { %v1037_v10 = vsel %vm288_vm6, %v1035_v7, %v1023_v3 }
 0xa22   :  { %v1357_v43 = vpop.eup %1356 }
 0xa23   :  { %v916_v44 = vsel %vm288_vm6, %v1357_v43, 0.0 }
 0xa24   :  { %v1359_v48 = vpop.eup %1358  ;;  %917 = vadd.xlane.f32.xlu0 %v916_v44 }
 0xa25   :  { %v913_v45 = vsel %vm288_vm6, %v1359_v48, 0.0 }
 0xa28   :  { %914 = vadd.xlane.f32.xlu0 %v913_v45 }
 0xa3e   :  { %925 = vrot.lane.b32.xlu0 %v1489_v46, %s1444_s29  ;;  %v1044_v46 = vld [vmem:[#allocation5 + $0x40] sm:$0xff] }
 0xa42   :  { %1020 = vrot.lane.b32.xlu0 %v797_v30, %s1445_s30 }
 0xaad   :  { %v918_v47 = vpop.xlane.xlu0 %917 }
 0xaae   :  { %1360 = vrcp.f32 %v918_v47 }
 0xab1   :  { %v915_v49 = vpop.xlane.xlu0 %914 }
 0xab2   :  { %1362 = vrcp.f32 %v915_v49 }
 0xab5   :  { %v926_v50 = vpop.permute.xlu0 %925 }
 0xab6   :  { %1288 = vmatprep.subr.mxu0 %v926_v50 }
 0xab7   :  { %1289 = vmatpush3.msra.mxu0 %v926_v50 }
 0xab8   :  { %1290 = vmatprep.subr.mxu0 %v924_v51 }
 0xab9   :  { %1291 = vmatpush3.msra.mxu0 %v924_v51  ;;  %v1021_v4 = vpop.permute.xlu0 %1020 }
 0xaba   :  { %1295 = vmatprep.subr.mxu0 %v1044_v46  ;;  %v1036_v8 = vsel %vm288_vm6, %v1034_v5, %v1021_v4 }
 0xabb   :  { %v1361_v53 = vpop.eup %1360 }
 0xabc   :  { %v922_v57 = vmul.f32 %v1361_v53, %v1357_v43 }
 0xabf   :  { %v1363_v54 = vpop.eup %1362 }
 0xac0   :  { %v920_v56 = vmul.f32 %v1363_v54, %v1359_v48 }
 0xac2   :  { %1292 = vmatprep.mubr.msk.f32.mxu0 %vm288_vm6, %v920_v56 }
 0xac3   :  { %1293 = vmatmul.mubr.msk.f32.vlgmr.msra.gmra.mxu0 %vm288_vm6, %v922_v57 }
 0xac4   :  { %1296 = vmatpush3.msra.mxu0 %v1044_v46 }
 0xac5   :  { %1297 = vmatprep.subr.mxu0 %v1043_v58 }
 0xac6   :  { %1298 = vmatpush3.msra.mxu0 %v1043_v58 }
 0xac7   :  { %1299 = vmatprep.subr.mxu0 %v1042_v59 }
 0xac8   :  { %1300 = vmatpush3.msra.mxu0 %v1042_v59 }
 0xac9   :  { %1301 = vmatprep.subr.mxu0 %v1041_v60 }
 0xaca   :  { %1302 = vmatpush3.msra.mxu0 %v1041_v60 }
 0xb83   :  { %v1294_v61 = vpop.f32.mrf.mxu0 }
 0xb84   :  { %1030 = vrot.lane.b32.xlu1 %v1294_v61, %s1446_s3 }
 0xb85   :  { %v1001_v62 = vpop.f32.mrf.mxu0 }
 0xb86   :  { %1028 = vrot.lane.b32.xlu0 %v1001_v62, %s1446_s3 }
 0xbf6   :  { %v1031_v6 = vpop.permute.xlu1 %1030 }
 0xbf7   :  { %v1040_v12 = vsel %vm1038_vm7, %v1037_v10, %v1031_v6 }
 0xbf8   :  { %v1029_v9 = vpop.permute.xlu0 %1028 }
 0xbf9   :  { %v1039_v11 = vsel %vm1038_vm7, %v1036_v8, %v1029_v9 }
 0xbfa   :  { %1303 = vmatprep.mubr.msk.f32.mxu0 %vm45_vm0, %v1039_v11 }
 0xbfb   :  { %1304 = vmatmul.mubr.msk.f32.vlgmr.msra.gmra.mxu0 %vm45_vm0, %v1040_v12 }
 0xcbb   :  { %v1305_v14 = vpop.f32.mrf.mxu0 }
 0xcbc   :  { %v1127_v15 = vadd.f32 %v1305_v14, %v1181_v13 }
 0xcbd   :  { %v1121_v22 = vpop.f32.mrf.mxu0 }
 0xcbe   :  { %v1131_v16 = vadd.f32 %v1127_v15, %v1477_v1  ;;  %v1122_v21 = vadd.f32 %v1181_v13, %v1121_v22 }
 0xcc0   :  { %1133 = vst.msk [vmem:[#allocation7 + $0x8] sm:$0xff] %vm45_vm0, %v1131_v16  ;;  %v1130_v17 = vadd.f32 %v1122_v21, %v1475_v0 }
 0xcc2   :  { %1132 = vst.msk [vmem:[#allocation7] sm:$0xff] %vm45_vm0, %v1130_v17 }
 0xcc3   :  { %1415 = shalt.err (!%p1412_p0)
}
 0xcc4   :  { %1145 = dma.vmem_to_hbm [thread:$0]  %s1140_s5, 256, %s1609_s2, [#allocation4], %s1431_s12, %s1431_s12, %s1432_s13  }
 0xcc5   :  { %1428 = dma.done.wait [#allocation4], 256  }
 0xcc6   :  { %1429 = vsyncadd [#allocation4], 4294967040 }
 0xcc7   :  { %1149 = vsyncpa [#allocation3], 1 }
 0xcc8   :  { %1150 = vsyncpa [#allocation6], 1 }
 0xcc9   :  { %1151 = vsyncpa [#allocation4], 1 }

</bundles_post_ra>
